<compile_context>
chip_gen: v7x
topology: tpu7x:2x2x1
jax: 0.10.0
libtpu: 0.0.40
codegen_flags: <defaults>
</compile_context>

<pallas_src>
import jax
import jax.numpy as jnp
from jax.experimental import pallas as pl
from jax.experimental.pallas import tpu as pltpu

IN_FEATURES = 100
OUT_FEATURES = 10

SUBLANE = 8          # f32 sublane granularity for the second-to-last dim
MAX_BLOCK_B = 1024   # batch-tile cap (~1.7 MiB double-buffered VMEM at f32)
MIN_GRID_STEPS = 8   # keep several grid steps so "parallel" can shard on v7x


def _round_up(n, m):
    return ((n + m - 1) // m) * m


def _choose_block_b(batch):
    """Batch tile: multiple of 8, aims for >= MIN_GRID_STEPS steps, <= cap."""
    tb = _round_up(-(-batch // MIN_GRID_STEPS), SUBLANE)
    return max(SUBLANE, min(MAX_BLOCK_B, tb, _round_up(batch, SUBLANE)))


def _linear_relu_kernel(x_ref, y_ref, w_ref, b_ref, o_ref):
    # x_ref, y_ref: (TB, 100); w_ref: (100, 10); b_ref: (1, 10); o_ref: (TB, 10)
    s = x_ref[...] + y_ref[...]                                        # VPU add
    acc = jnp.dot(s, w_ref[...], preferred_element_type=jnp.float32)   # MXU
    o_ref[...] = jnp.maximum(acc + b_ref[...], 0.0).astype(o_ref.dtype)


@jax.jit
def linear_relu(x, y, w, b):
    """relu((x + y) @ w.T + b).  x, y: (B, 100) f32; w: (10, 100); b: (10,)."""
    B, IN = x.shape
    OUT = w.shape[0]

    tb = _choose_block_b(B)
    grid = (pl.cdiv(B, tb),)

    w_t = w.T                 # (IN, OUT) — tiny, stays VMEM-resident
    b2 = b.reshape(1, OUT)

    return pl.pallas_call(
        _linear_relu_kernel,
        out_shape=jax.ShapeDtypeStruct((B, OUT), jnp.float32),
        grid_spec=pl.GridSpec(
            grid=grid,
            in_specs=[
                pl.BlockSpec((tb, IN), lambda i: (i, 0)),     # x tile
                pl.BlockSpec((tb, IN), lambda i: (i, 0)),     # y tile
                pl.BlockSpec((IN, OUT), lambda i: (0, 0)),    # weight (resident)
                pl.BlockSpec((1, OUT), lambda i: (0, 0)),     # bias (resident)
            ],
            out_specs=pl.BlockSpec((tb, OUT), lambda i: (i, 0)),
        ),
        compiler_params=pltpu.CompilerParams(
            dimension_semantics=("parallel",),
        ),
        cost_estimate=pl.CostEstimate(
            flops=2 * B * IN * OUT + B * IN + 2 * B * OUT,
            transcendentals=0,
            bytes_accessed=4 * (2 * B * IN + IN * OUT + OUT + B * OUT),
        ),
    )(x, y, w_t, b2)


if __name__ == "__main__":
    key = jax.random.PRNGKey(0)
    kx, ky, kw, kb = jax.random.split(key, 4)

    # Deterministic parameter init (PyTorch-Linear-style uniform bound).
    bound = 1.0 / (IN_FEATURES ** 0.5)
    w = jax.random.uniform(kw, (OUT_FEATURES, IN_FEATURES),
                           minval=-bound, maxval=bound, dtype=jnp.float32)
    b = jax.random.uniform(kb, (OUT_FEATURES,),
                           minval=-bound, maxval=bound, dtype=jnp.float32)

    # Small shapes consistent with the module: (batch, 100) inputs.
    B = 8
    x = jax.random.normal(kx, (B, IN_FEATURES), dtype=jnp.float32)
    y = jax.random.normal(ky, (B, IN_FEATURES), dtype=jnp.float32)

    out = linear_relu(x, y, w, b)
    jax.block_until_ready(out)

    ref = jnp.maximum((x + y) @ w.T + b, 0.0)
    assert out.shape == (B, OUT_FEATURES)
    assert jnp.allclose(out, ref, atol=1e-5, rtol=1e-5)

    # Non-multiple-of-8 batch: exercises the ragged-last-block (masked
    # writeback) path with a multi-step grid.
    B2 = 37
    x2 = jax.random.normal(kx, (B2, IN_FEATURES), dtype=jnp.float32)
    y2 = jax.random.normal(ky, (B2, IN_FEATURES), dtype=jnp.float32)
    out2 = linear_relu(x2, y2, w, b)
    jax.block_until_ready(out2)
    ref2 = jnp.maximum((x2 + y2) @ w.T + b, 0.0)
    assert out2.shape == (B2, OUT_FEATURES)
    assert jnp.allclose(out2, ref2, atol=1e-5, rtol=1e-5)

    # Larger batch: multiple grid steps with the capped tile.
    B3 = 300
    x3 = jax.random.normal(kx, (B3, IN_FEATURES), dtype=jnp.float32)
    y3 = jax.random.normal(ky, (B3, IN_FEATURES), dtype=jnp.float32)
    out3 = linear_relu(x3, y3, w, b)
    jax.block_until_ready(out3)
    ref3 = jnp.maximum((x3 + y3) @ w.T + b, 0.0)
    assert out3.shape == (B3, OUT_FEATURES)
    assert jnp.allclose(out3, ref3, atol=1e-5, rtol=1e-5)

    print("KERNEL_OK")
</pallas_src>

<mosaic_0001>
module attributes {stable_mosaic.version = 11 : i64} {
  func.func @_linear_relu_kernel(%arg0: i32, %arg1: memref<8x100xf32, #tpu.memory_space<vmem>>, %arg2: memref<8x100xf32, #tpu.memory_space<vmem>>, %arg3: memref<100x10xf32, #tpu.memory_space<vmem>>, %arg4: memref<1x10xf32, #tpu.memory_space<vmem>>, %arg5: memref<8x10xf32, #tpu.memory_space<vmem>>) attributes {dimension_semantics = [#tpu.dimension_semantics<parallel>], iteration_bounds = array<i64: 1>, scalar_prefetch = 0 : i64, scratch_operands = 0 : i64, tpu.core_type = #tpu.core_type<tc>, window_params = [{transform_indices = @transform_0, window_bounds = array<i64: 8, 100>}, {transform_indices = @transform_1, window_bounds = array<i64: 8, 100>}, {pipeline_mode = #tpu.pipeline_mode<synchronous>, transform_indices = @transform_2, window_bounds = array<i64: 100, 10>}, {pipeline_mode = #tpu.pipeline_mode<synchronous>, transform_indices = @transform_3, window_bounds = array<i64: 1, 10>}, {transform_indices = @transform_4, window_bounds = array<i64: 8, 10>}]} {
    %c0 = arith.constant 0 : index
    %c0_0 = arith.constant 0 : index
    %0 = vector.load %arg1[%c0, %c0_0] : memref<8x100xf32, #tpu.memory_space<vmem>>, vector<8x100xf32>
    %c0_1 = arith.constant 0 : index
    %c0_2 = arith.constant 0 : index
    %1 = vector.load %arg2[%c0_1, %c0_2] : memref<8x100xf32, #tpu.memory_space<vmem>>, vector<8x100xf32>
    %2 = arith.addf %0, %1 : vector<8x100xf32>
    %c0_3 = arith.constant 0 : index
    %c0_4 = arith.constant 0 : index
    %3 = vector.load %arg3[%c0_3, %c0_4] : memref<100x10xf32, #tpu.memory_space<vmem>>, vector<100x10xf32>
    %cst = arith.constant dense<0.000000e+00> : vector<8x10xf32>
    %4 = tpu.matmul %2, %3, %cst {dimension_numbers = #tpu.dot_dimension_numbers<[1], [0], [0], [1], [0, 0, 1, 1], [], []>} : vector<8x100xf32>, vector<100x10xf32>, vector<8x10xf32> -> vector<8x10xf32>
    %c0_5 = arith.constant 0 : index
    %c0_6 = arith.constant 0 : index
    %5 = vector.load %arg4[%c0_5, %c0_6] : memref<1x10xf32, #tpu.memory_space<vmem>>, vector<1x10xf32>
    %6 = vector.broadcast %5 : vector<1x10xf32> to vector<8x10xf32>
    %7 = arith.addf %4, %6 : vector<8x10xf32>
    %cst_7 = arith.constant 0.000000e+00 : f32
    %8 = vector.broadcast %cst_7 : f32 to vector<8x10xf32>
    %9 = arith.maximumf %7, %8 : vector<8x10xf32>
    %c0_8 = arith.constant 0 : index
    %c0_9 = arith.constant 0 : index
    %10 = vector.load %arg5[%c0_8, %c0_9] : memref<8x10xf32, #tpu.memory_space<vmem>>, vector<8x10xf32>
    tpu.vector_store %arg5[%c0_8, %c0_9], %9 {strides = array<i32>} : memref<8x10xf32, #tpu.memory_space<vmem>>, vector<8x10xf32>,
    return
  }
  func.func @transform_0(%arg0: i32) -> (i32, i32) {
    %c0_i32 = arith.constant 0 : i32
    %c0_i32_0 = arith.constant 0 : i32
    return %arg0, %c0_i32 : i32, i32
  }
  func.func @transform_1(%arg0: i32) -> (i32, i32) {
    %c0_i32 = arith.constant 0 : i32
    %c0_i32_0 = arith.constant 0 : i32
    return %arg0, %c0_i32 : i32, i32
  }
  func.func @transform_2(%arg0: i32) -> (i32, i32) {
    %c0_i32 = arith.constant 0 : i32
    %c0_i32_0 = arith.constant 0 : i32
    %c0_i32_1 = arith.constant 0 : i32
    return %c0_i32, %c0_i32_0 : i32, i32
  }
  func.func @transform_3(%arg0: i32) -> (i32, i32) {
    %c0_i32 = arith.constant 0 : i32
    %c0_i32_0 = arith.constant 0 : i32
    %c0_i32_1 = arith.constant 0 : i32
    return %c0_i32, %c0_i32_0 : i32, i32
  }
  func.func @transform_4(%arg0: i32) -> (i32, i32) {
    %c0_i32 = arith.constant 0 : i32
    %c0_i32_0 = arith.constant 0 : i32
    return %arg0, %c0_i32 : i32, i32
  }
}

</mosaic_0001>

<bundles_post_ra>
// kernel: linear_relu.1
= control target key start
LH: loop header
LB: loop body
LE: loop exit
PB: predicated region body
PF: predicated region fallthrough
CT: control target
= control target key end

     0   :  { %v228_v3 = vmov 0.0|0.0   ;;  %vm229_vm0 = vmmov 0   ;;  %v230_v6 = vmov 0.0   ;;  %s317_s0 = inlined_call_operand.vmem [shape: f32[8,100], index: 0, kind: input, shape index: {}]   ;;  %s318_s1 = inlined_call_operand.vmem [shape: f32[8,100], index: 1, kind: input, shape index: {}]   ;;  %s319_s2 = inlined_call_operand.vmem [shape: f32[100,10], index: 2, kind: input, shape index: {}]   ;;  %s320_s3 = inlined_call_operand.vmem [shape: f32[1,10], index: 3, kind: input, shape index: {}]   ;;  %s321_s4 = inlined_call_operand.hbm [shape: f32[8,10], index: 4, kind: output, shape index: {}]  }
   0x1   :  { %v21_v0 = vld [vmem:[%s319_s2] sm:$0xff]  ;;  %v22_v1 = vld [vmem:[%s319_s2 + $0x8] sm:$0xff]  ;;  %v23_v2 = vld [vmem:[%s319_s2 + $0x10] sm:$0xff]  ;;  %182 = vmatprep.subr.bf16.mxu0 %v228_v3  ;;  %179 = vmatprep.mubr.msk.f32.mxu0 %vm229_vm0, %v230_v6 }
   0x2   :  { %v183_v4 = vpack.c.bf16 %v22_v1, %v21_v0  ;;  %v24_v5 = vld [vmem:[%s319_s2 + $0x18] sm:$0xff]  ;;  %v25_v8 = vld [vmem:[%s319_s2 + $0x20] sm:$0xff]  ;;  %v26_v9 = vld [vmem:[%s319_s2 + $0x28] sm:$0xff] }
   0x3   :  { %v186_v7 = vpack.c.bf16 %v24_v5, %v23_v2 }
   0x4   :  { %184 = vmatpush3.bf16.msra.mxu0 %v183_v4 }
   0x5   :  { %185 = vmatprep.subr.bf16.mxu0 %v228_v3 }
   0x6   :  { %9 = vsyncpa [#allocation3], 0  ;;  %v189_v10 = vpack.c.bf16 %v26_v9, %v25_v8  ;;  %v27_v11 = vld [vmem:[%s319_s2 + $0x30] sm:$0xff]  ;;  %v28_v12 = vld [vmem:[%s319_s2 + $0x38] sm:$0xff]  ;;  %vm45_vm1 = vcmask 1043456   ;;  %vm41_vm2 = vcmask 818176  }
   0x7   :  { %v192_v13 = vpack.c.bf16 %v28_v12, %v27_v11  ;;  %v29_v14 = vld [vmem:[%s319_s2 + $0x40] sm:$0xff]  ;;  %v30_v15 = vld [vmem:[%s319_s2 + $0x48] sm:$0xff]  ;;  %v31_v17 = vld [vmem:[%s319_s2 + $0x50] sm:$0xff]  ;;  %vm120_vm3 = vcmask 80896  }
   0x8   :  { %187 = vmatpush3.bf16.msra.mxu0 %v186_v7  ;;  %v195_v16 = vpack.c.bf16 %v30_v15, %v29_v14  ;;  %v32_v18 = vld [vmem:[%s319_s2 + $0x58] sm:$0xff]  ;;  %v18_v20 = vld [vmem:[%s317_s0] sm:$0xff]  ;;  %s231_s0 = smov [#allocation2]  }
   0x9   :  { %188 = vmatprep.subr.bf16.mxu0 %v228_v3  ;;  %v198_v19 = vpack.c.bf16 %v32_v18, %v31_v17  ;;  %v19_v21 = vld [vmem:[%s318_s1] sm:$0xff]  ;;  %s128_s21 = sshll.u32 %s231_s0, 4  ;;  %s129_s21 = int_to_ptr.vmem [resolvable:$true] %s128_s21 }
   0xa   :  { %v33_v22 = vld [vmem:[%s319_s2 + $0x60] sm:$0xf]  ;;  %v20_v23 = vadd.f32 %v19_v21, %v18_v20  ;;  %s204_s1 = scalar_lea.vmem %s129_s21, 128  ;;  %p209_p1 = scmp.lt.s32.totalorder %s129_s21, %s129_s21 }
   0xb   :  { %v136_v24 = vld [vmem:[%s320_s3] ss:$0 sm:$0xff]  ;;  %p205_p0 = scmp.ne.s32.totalorder %s129_s21, %s204_s1  ;;  %p210_p2 = scmp.lt.s32.totalorder %s204_s1, %s204_s1 }
   0xc   :  { %190 = vmatpush3.bf16.msra.mxu0 %v189_v10 }
   0xd   :  { %191 = vmatprep.subr.bf16.mxu0 %v228_v3  ;;  %p211_p3 = por %p210_p2, %p209_p1 }
   0xf   :  { %p212_p4 = pnand %p211_p3, %p205_p0 }
  0x10   :  { %193 = vmatpush3.bf16.msra.mxu0 %v192_v13 }
  0x11   :  { %194 = vmatprep.subr.bf16.mxu0 %v228_v3 }
  0x14   :  { %196 = vmatpush3.bf16.msra.mxu0 %v195_v16 }
  0x15   :  { %197 = vmatprep.subr.bf16.mxu0 %v228_v3 }
  0x18   :  { %199 = vmatpush3.bf16.msra.mxu0 %v198_v19 }
  0x19   :  { %177 = vmatprep.subr.mxu0 %v230_v6 }
  0x1c   :  { %178 = vmatpush3.msk.msra.mxu0 %vm45_vm1, %v33_v22 }
  0x1d   :  { %180 = vmatmul.mubr.msk.f32.vlgmr.msra.gmra.mrb[0].mxu0 %vm41_vm2, %v20_v23 }
  0xf0   :  { %v115_v25 = vpop.f32.mrb[0].mxu0 }
  0xf1   :  { %v116_v26 = vadd.f32 %v136_v24, %v115_v25  ;;  %v181_v27 = vpop.f32.mrb[1].mxu0 }
  0xf3   :  { %v119_v28 = vmax.f32 %v116_v26, 0.0 }
  0xf5   :  { %121 = vst.msk [vmem:[#allocation2] sm:$0xff] %vm120_vm3, %v119_v28 }
  0xf6   :  { %215 = shalt.err (!%p212_p4)
}
  0xf7   :  { %s216_s3 = scalar_lea.hbm %s321_s4, 128 }
  0xf8   :  { %p217_p5 = scmp.ne.s32.totalorder %s321_s4, %s216_s3  ;;  %p220_p6 = scmp.lt.u32.totalorder %s216_s3, %s321_s4 }
  0xfa   :  { %p222_p7 = pnand %p220_p6, %p217_p5 }
  0xfc   :  { %225 = shalt.err (!%p222_p7)
}
  0xfd   :  { %131 = dma.vmem_to_hbm [thread:$0]  %s129_s21, 128, %s321_s4, [#allocation3]  }
  0xfe   :  { %226 = dma.done.wait [#allocation3], 128  }
  0xff   :  { %227 = vsyncadd [#allocation3], 4294967168 }
 0x100   :  { %135 = vsyncpa [#allocation3], 1 }

</bundles_post_ra>
